<compile_context>
chip_gen: v7x
topology: tpu7x:2x2x1
jax: 0.10.0
libtpu: 0.0.40
codegen_flags: <defaults>
</compile_context>

<pallas_src>
import functools

import numpy as np
import jax
import jax.numpy as jnp
from jax.experimental import pallas as pl
from jax.experimental.pallas import tpu as pltpu

LEAKY_SLOPE = 0.01   # nn.LeakyReLU default
BN_EPS = 1e-5


def _leaky(z):
    # max(z, a*z) == LeakyReLU(z) for 0 < a < 1.
    return jnp.maximum(z, LEAKY_SLOPE * z)


def _build_stacked_weights(w_hwio, scale, W, C):
    """Host-side (numpy) construction of the banded conv weight matrix.

    Returns Wstk of shape (3*PW, PW), PW = 2*W*C, such that with image rows
    packed two-at-a-time into pair vectors Xp of length PW:

        Y[q] = concat([Xp[q-1], Xp[q], Xp[q+1]], axis=lanes) @ Wstk

    is the 3x3 "same" convolution of output pair q (the caller must zero the
    Xp[q-1] / Xp[q+1] operands at image top / bottom pairs).  Width padding is
    folded into the zero structure; the eval-mode BN scale is folded into the
    output columns.
    """
    PW = 2 * W * C
    wstk = np.zeros((3 * PW, PW), np.float32)
    for idx, d in enumerate((-1, 0, 1)):          # input pair offset vs output pair
        for r_in in range(2):
            for r_out in range(2):
                ky = 2 * d + r_in - r_out         # input_row - output_row
                if ky < -1 or ky > 1:
                    continue
                for w_out in range(W):
                    for kx in (-1, 0, 1):
                        w_in = w_out + kx
                        if w_in < 0 or w_in >= W:
                            continue
                        r = idx * PW + r_in * W * C + w_in * C
                        c = r_out * W * C + w_out * C
                        # (Cin, Cout) tap block.
                        wstk[r:r + C, c:c + C] = w_hwio[ky + 1, kx + 1]
    # Fold BN scale (per output channel) into the output columns.
    wstk *= np.tile(scale, 2 * W)[None, :]
    return wstk


def _res_net_kernel(x_ref, w_ref, bias_ref, out_ref, *, hp):
    """One grid step processes nb images.

    x_ref   : (nb*hp, PW) f32   packed input row-pairs (also the residual)
    w_ref   : (3*PW, PW)        banded conv matrix [A; B; C_], BN scale folded
    bias_ref: (1, PW)    f32    folded conv-bias + BN shift
    out_ref : (nb*hp, PW) f32
    """
    R, pw = x_ref.shape
    x = x_ref[...]
    bias = bias_ref[...]
    w = w_ref[...]

    # Image-boundary masks at pair-row granularity (computed once, reused by
    # both convs).  Row r is the top pair of its image iff (r % hp) == 0 and
    # the bottom pair iff (r % hp) == hp-1; those rows get no prev/next pair.
    row = jax.lax.broadcasted_iota(jnp.int32, (R, pw), 0)
    local = row % hp
    has_prev = local != 0
    has_next = local != (hp - 1)

    def conv_bn(z):
        # prev pair: out[i] <- z[i-1]; next pair: out[i] <- z[i+1] (positive
        # shifts only; wrap-around rows are exactly the masked boundary rows).
        zp = jnp.where(has_prev, pltpu.roll(z, shift=1, axis=0), 0.0)
        zn = jnp.where(has_next, pltpu.roll(z, shift=R - 1, axis=0), 0.0)
        lhs = jnp.concatenate([zp, z, zn], axis=1).astype(w.dtype)  # (R, 3*PW)
        return jnp.dot(lhs, w, preferred_element_type=jnp.float32) + bias

    # conv1 -> BN -> LeakyReLU
    y1 = _leaky(conv_bn(x))
    # conv1 -> BN -> + residual -> LeakyReLU   (Dropout2d = identity in eval)
    out_ref[...] = _leaky(conv_bn(y1) + x)


def res_net_forward(x_nchw, params, *, images_per_step=None,
                    matmul_dtype=jnp.bfloat16):
    """Pallas implementation of Res_Net.forward (eval mode). x_nchw: (N,C,H,W) f32.

    images_per_step: images per grid step (default: whole batch, grid=(1,)).
      On v7x pass N//2 (grid length 2) so both TensorCores get a parallel step.
    matmul_dtype: MXU operand dtype (bf16 default; f32 for exact validation).
    """
    N, C, H, W = x_nchw.shape
    assert H % 2 == 0, "pair-packed layout requires even H"
    hp = H // 2
    pw = 2 * W * C   # 128 for (W, C) = (16, 4): fully lane-dense; other sizes
    #                  are still correct, just not 128-lane aligned.
    nb = N if images_per_step is None else images_per_step
    assert N % nb == 0

    # --- Host-side (numpy) parameter folding, done once per parameter set. ---
    w_np = np.asarray(params["conv1_w"], np.float32)      # (Cout, Cin, 3, 3)
    b_np = np.asarray(params["conv1_b"], np.float32)
    gamma = np.asarray(params["bn_gamma"], np.float32)
    beta = np.asarray(params["bn_beta"], np.float32)
    mean = np.asarray(params["bn_mean"], np.float32)
    var = np.asarray(params["bn_var"], np.float32)

    scale = gamma / np.sqrt(var + BN_EPS)                  # (C,)
    bias = (b_np - mean) * scale + beta                    # (C,)

    w_hwio = np.transpose(w_np, (2, 3, 1, 0))              # (3, 3, Cin, Cout)
    wstk = jnp.asarray(_build_stacked_weights(w_hwio, scale, W, C), matmul_dtype)
    bias_row = jnp.asarray(np.tile(bias, 2 * W)[None, :], jnp.float32)  # (1, pw)

    # NCHW -> lane-dense packed pair layout (N*H/2, 2*W*C) = (16, 128) here.
    # TODO(synk): if this block is chained, keep the packed layout between
    # blocks instead of converting NCHW <-> packed around every call.
    x_packed = jnp.transpose(x_nchw, (0, 2, 3, 1)).reshape(N * hp, pw)

    kernel = functools.partial(_res_net_kernel, hp=hp)
    out_packed = pl.pallas_call(
        kernel,
        out_shape=jax.ShapeDtypeStruct((N * hp, pw), jnp.float32),
        grid_spec=pltpu.PrefetchScalarGridSpec(
            num_scalar_prefetch=0,
            grid=(N // nb,),
            in_specs=[
                pl.BlockSpec((nb * hp, pw), lambda i: (i, 0)),
                pl.BlockSpec((3 * pw, pw), lambda i: (0, 0)),
                pl.BlockSpec((1, pw), lambda i: (0, 0)),
            ],
            out_specs=pl.BlockSpec((nb * hp, pw), lambda i: (i, 0)),
        ),
        compiler_params=pltpu.CompilerParams(
            dimension_semantics=("parallel",)),
    )(x_packed, wstk, bias_row)

    # Packed pairs -> NCHW.
    out = out_packed.reshape(N, hp, 2, W, C)
    out = jnp.transpose(out, (0, 4, 1, 2, 3)).reshape(N, C, H, W)
    return out


def res_net_reference(x, params):
    """Pure-JAX reference of the same forward pass (eval mode), NCHW."""
    w, b = params["conv1_w"], params["conv1_b"]
    gamma, beta = params["bn_gamma"], params["bn_beta"]
    mean, var = params["bn_mean"], params["bn_var"]

    def conv(z):
        y = jax.lax.conv_general_dilated(
            z, w, window_strides=(1, 1), padding=((1, 1), (1, 1)),
            dimension_numbers=("NCHW", "OIHW", "NCHW"),
            precision=jax.lax.Precision.HIGHEST)
        return y + b[None, :, None, None]

    def bn(z):
        s = gamma / jnp.sqrt(var + BN_EPS)
        return (z - mean[None, :, None, None]) * s[None, :, None, None] \
            + beta[None, :, None, None]

    out = jnp.maximum(bn(conv(x)), LEAKY_SLOPE * bn(conv(x)))
    out = bn(conv(out)) + x
    return jnp.maximum(out, LEAKY_SLOPE * out)


def init_params(key, c):
    k = jax.random.split(key, 6)
    return {
        "conv1_w": 0.1 * jax.random.normal(k[0], (c, c, 3, 3), jnp.float32),
        "conv1_b": 0.1 * jax.random.normal(k[1], (c,), jnp.float32),
        "bn_gamma": 1.0 + 0.1 * jax.random.normal(k[2], (c,), jnp.float32),
        "bn_beta": 0.1 * jax.random.normal(k[3], (c,), jnp.float32),
        "bn_mean": 0.1 * jax.random.normal(k[4], (c,), jnp.float32),
        "bn_var": 0.5 + jnp.abs(jax.random.normal(k[5], (c,), jnp.float32)) * 0.1,
    }


if __name__ == "__main__":
    N, C, H, W = 2, 4, 16, 16
    key = jax.random.PRNGKey(0)
    kx, kp = jax.random.split(key)
    x = jax.random.normal(kx, (N, C, H, W), jnp.float32)
    params = init_params(kp, C)

    ref = jax.block_until_ready(res_net_reference(x, params))

    # 1) Exact-structure check: f32 MXU operands must match the f32 reference
    #    tightly (validates the roll/mask/banded-matmul reformulation itself).
    out_f32 = jax.block_until_ready(
        res_net_forward(x, params, matmul_dtype=jnp.float32))
    np.testing.assert_allclose(np.asarray(out_f32), np.asarray(ref),
                               rtol=2e-3, atol=2e-3)

    # 2) Default fast path: bf16 MXU operands with f32 accumulation.  Tolerance
    #    is set for bf16 operand quantization (~2^-8 relative) over two chained
    #    convolutions; elementwise math is still f32.
    out = jax.block_until_ready(res_net_forward(x, params))
    np.testing.assert_allclose(np.asarray(out), np.asarray(ref),
                               rtol=3e-2, atol=3e-2)

    print("KERNEL_OK")
</pallas_src>

<mosaic_0001>
module attributes {stable_mosaic.version = 11 : i64} {
  func.func @_res_net_kernel(%arg0: i32, %arg1: memref<16x128xf32, #tpu.memory_space<vmem>>, %arg2: memref<384x128xf32, #tpu.memory_space<vmem>>, %arg3: memref<1x128xf32, #tpu.memory_space<vmem>>, %arg4: memref<16x128xf32, #tpu.memory_space<vmem>>) attributes {dimension_semantics = [#tpu.dimension_semantics<parallel>], iteration_bounds = array<i64: 1>, scalar_prefetch = 0 : i64, scratch_operands = 0 : i64, tpu.core_type = #tpu.core_type<tc>, window_params = [{transform_indices = @transform_0, window_bounds = array<i64: 16, 128>}, {pipeline_mode = #tpu.pipeline_mode<synchronous>, transform_indices = @transform_1, window_bounds = array<i64: 384, 128>}, {pipeline_mode = #tpu.pipeline_mode<synchronous>, transform_indices = @transform_2, window_bounds = array<i64: 1, 128>}, {transform_indices = @transform_3, window_bounds = array<i64: 16, 128>}]} {
    %c0 = arith.constant 0 : index
    %c0_0 = arith.constant 0 : index
    %0 = vector.load %arg1[%c0, %c0_0] : memref<16x128xf32, #tpu.memory_space<vmem>>, vector<16x128xf32>
    %c0_1 = arith.constant 0 : index
    %c0_2 = arith.constant 0 : index
    %1 = vector.load %arg3[%c0_1, %c0_2] : memref<1x128xf32, #tpu.memory_space<vmem>>, vector<1x128xf32>
    %c0_3 = arith.constant 0 : index
    %c0_4 = arith.constant 0 : index
    %2 = vector.load %arg2[%c0_3, %c0_4] : memref<384x128xf32, #tpu.memory_space<vmem>>, vector<384x128xf32>
    %3 = tpu.iota {dimensions = array<i32: 0>} : vector<16x128xi32>
    %c8_i32 = arith.constant 8 : i32
    %c0_i32 = arith.constant 0 : i32
    %4 = arith.cmpi eq, %c8_i32, %c0_i32 : i32
    %c1_i32 = arith.constant 1 : i32
    %5 = arith.select %4, %c1_i32, %c8_i32 : i32
    %6 = vector.broadcast %5 : i32 to vector<16x128xi32>
    %7 = arith.remsi %3, %6 : vector<16x128xi32>
    %c0_i32_5 = arith.constant 0 : i32
    %8 = vector.broadcast %c0_i32_5 : i32 to vector<16x128xi32>
    %9 = arith.cmpi ne, %7, %8 : vector<16x128xi32>
    %c0_i32_6 = arith.constant 0 : i32
    %10 = vector.broadcast %c0_i32_6 : i32 to vector<16x128xi32>
    %11 = arith.cmpi slt, %7, %10 : vector<16x128xi32>
    %c0_i32_7 = arith.constant 0 : i32
    %12 = arith.cmpi slt, %5, %c0_i32_7 : i32
    %13 = vector.broadcast %12 : i1 to vector<16x128xi1>
    %14 = vector.broadcast %13 : vector<16x128xi1> to vector<16x128xi1>
    %15 = arith.xori %11, %14 : vector<16x128xi1>
    %16 = arith.andi %15, %9 : vector<16x128xi1>
    %17 = vector.broadcast %5 : i32 to vector<16x128xi32>
    %18 = arith.addi %7, %17 : vector<16x128xi32>
    %19 = arith.select %16, %18, %7 : vector<16x128xi1>, vector<16x128xi32>
    %c0_i32_8 = arith.constant 0 : i32
    %20 = vector.broadcast %c0_i32_8 : i32 to vector<16x128xi32>
    %21 = arith.cmpi ne, %19, %20 : vector<16x128xi32>
    %c7_i32 = arith.constant 7 : i32
    %22 = vector.broadcast %c7_i32 : i32 to vector<16x128xi32>
    %23 = arith.cmpi ne, %19, %22 : vector<16x128xi32>
    %c1_i32_9 = arith.constant 1 : i32
    %24 = tpu.dynamic_rotate %0 by %c1_i32_9 dim 0 : vector<16x128xf32>, i32 -> vector<16x128xf32>
    %cst = arith.constant 0.000000e+00 : f32
    %25 = vector.broadcast %cst : f32 to vector<16x128xf32>
    %26 = arith.select %21, %24, %25 : vector<16x128xi1>, vector<16x128xf32>
    %c15_i32 = arith.constant 15 : i32
    %27 = tpu.dynamic_rotate %0 by %c15_i32 dim 0 : vector<16x128xf32>, i32 -> vector<16x128xf32>
    %cst_10 = arith.constant 0.000000e+00 : f32
    %28 = vector.broadcast %cst_10 : f32 to vector<16x128xf32>
    %29 = arith.select %23, %27, %28 : vector<16x128xi1>, vector<16x128xf32>
    %30 = tpu.concatenate %26, %0, %29 in 1 : vector<16x128xf32>, vector<16x128xf32>, vector<16x128xf32> -> vector<16x384xf32>
    %cst_11 = arith.constant dense<0.000000e+00> : vector<16x128xf32>
    %31 = tpu.matmul %30, %2, %cst_11 {dimension_numbers = #tpu.dot_dimension_numbers<[1], [0], [0], [1], [0, 0, 1, 1], [], []>} : vector<16x384xf32>, vector<384x128xf32>, vector<16x128xf32> -> vector<16x128xf32>
    %32 = vector.broadcast %1 : vector<1x128xf32> to vector<16x128xf32>
    %33 = arith.addf %31, %32 : vector<16x128xf32>
    %cst_12 = arith.constant 0.00999999977 : f32
    %34 = vector.broadcast %cst_12 : f32 to vector<16x128xf32>
    %35 = arith.mulf %34, %33 : vector<16x128xf32>
    %36 = arith.maximumf %33, %35 : vector<16x128xf32>
    %c1_i32_13 = arith.constant 1 : i32
    %37 = tpu.dynamic_rotate %36 by %c1_i32_13 dim 0 : vector<16x128xf32>, i32 -> vector<16x128xf32>
    %cst_14 = arith.constant 0.000000e+00 : f32
    %38 = vector.broadcast %cst_14 : f32 to vector<16x128xf32>
    %39 = arith.select %21, %37, %38 : vector<16x128xi1>, vector<16x128xf32>
    %c15_i32_15 = arith.constant 15 : i32
    %40 = tpu.dynamic_rotate %36 by %c15_i32_15 dim 0 : vector<16x128xf32>, i32 -> vector<16x128xf32>
    %cst_16 = arith.constant 0.000000e+00 : f32
    %41 = vector.broadcast %cst_16 : f32 to vector<16x128xf32>
    %42 = arith.select %23, %40, %41 : vector<16x128xi1>, vector<16x128xf32>
    %43 = tpu.concatenate %39, %36, %42 in 1 : vector<16x128xf32>, vector<16x128xf32>, vector<16x128xf32> -> vector<16x384xf32>
    %cst_17 = arith.constant dense<0.000000e+00> : vector<16x128xf32>
    %44 = tpu.matmul %43, %2, %cst_17 {dimension_numbers = #tpu.dot_dimension_numbers<[1], [0], [0], [1], [0, 0, 1, 1], [], []>} : vector<16x384xf32>, vector<384x128xf32>, vector<16x128xf32> -> vector<16x128xf32>
    %45 = vector.broadcast %1 : vector<1x128xf32> to vector<16x128xf32>
    %46 = arith.addf %44, %45 : vector<16x128xf32>
    %47 = arith.addf %46, %0 : vector<16x128xf32>
    %cst_18 = arith.constant 0.00999999977 : f32
    %48 = vector.broadcast %cst_18 : f32 to vector<16x128xf32>
    %49 = arith.mulf %48, %47 : vector<16x128xf32>
    %50 = arith.maximumf %47, %49 : vector<16x128xf32>
    %c0_19 = arith.constant 0 : index
    %c0_20 = arith.constant 0 : index
    %51 = vector.load %arg4[%c0_19, %c0_20] : memref<16x128xf32, #tpu.memory_space<vmem>>, vector<16x128xf32>
    tpu.vector_store %arg4[%c0_19, %c0_20], %50 {strides = array<i32>} : memref<16x128xf32, #tpu.memory_space<vmem>>, vector<16x128xf32>,
    return
  }
  func.func @transform_0(%arg0: i32) -> (i32, i32) {
    %c0_i32 = arith.constant 0 : i32
    %c0_i32_0 = arith.constant 0 : i32
    return %arg0, %c0_i32 : i32, i32
  }
  func.func @transform_1(%arg0: i32) -> (i32, i32) {
    %c0_i32 = arith.constant 0 : i32
    %c0_i32_0 = arith.constant 0 : i32
    %c0_i32_1 = arith.constant 0 : i32
    return %c0_i32, %c0_i32_0 : i32, i32
  }
  func.func @transform_2(%arg0: i32) -> (i32, i32) {
    %c0_i32 = arith.constant 0 : i32
    %c0_i32_0 = arith.constant 0 : i32
    %c0_i32_1 = arith.constant 0 : i32
    return %c0_i32, %c0_i32_0 : i32, i32
  }
  func.func @transform_3(%arg0: i32) -> (i32, i32) {
    %c0_i32 = arith.constant 0 : i32
    %c0_i32_0 = arith.constant 0 : i32
    return %arg0, %c0_i32 : i32, i32
  }
}

</mosaic_0001>

<bundles_post_ra>
// kernel: tpu_custom_call.1
= control target key start
LH: loop header
LB: loop body
LE: loop exit
PB: predicated region body
PF: predicated region fallthrough
CT: control target
= control target key end

     0   :  { %8 = vsyncpa [#allocation3], 0  ;;  %s1110_s0 = inlined_call_operand.hbm [shape: f32[16,128], index: 0, kind: input, shape index: {}]   ;;  %s1111_s1 = inlined_call_operand.hbm [shape: f32[384,128], index: 1, kind: input, shape index: {}]   ;;  %s1112_s2 = inlined_call_operand.vmem [shape: f32[1,128], index: 2, kind: input, shape index: {}]   ;;  %s1113_s3 = inlined_call_operand.hbm [shape: f32[16,128], index: 3, kind: output, shape index: {}]  }
   0x1   :  { %9 = vsyncpa [#allocation6], 0 }
   0x2   :  { %10 = vsyncpa [#allocation4], 0  ;;  %s883_s12 = smov [#allocation2]   ;;  %s811_s16 = scalar_lea.hbm %s1110_s0, 256 }
   0x3   :  { %s16_s13 = sshll.u32 %s883_s12, 4  ;;  %p812_p0 = scmp.ne.s32.totalorder %s1110_s0, %s811_s16  ;;  %s17_s13 = int_to_ptr.vmem [resolvable:$true] %s16_s13 }
   0x4   :  { %p815_p1 = scmp.lt.u32.totalorder %s811_s16, %s1110_s0 }
   0x6   :  { %p817_p2 = pnand %p815_p1, %p812_p0 }
   0x8   :  { %820 = shalt.err (!%p817_p2)
}
   0x9   :  { %s821_s21 = scalar_lea.vmem %s17_s13, 256  ;;  %p826_p4 = scmp.lt.s32.totalorder %s17_s13, %s17_s13 }
   0xa   :  { %p822_p3 = scmp.ne.s32.totalorder %s17_s13, %s821_s21  ;;  %p827_p5 = scmp.lt.s32.totalorder %s821_s21, %s821_s21 }
   0xc   :  { %p828_p6 = por %p827_p5, %p826_p4 }
   0xe   :  { %p829_p7 = pnand %p828_p6, %p822_p3 }
  0x10   :  { %832 = shalt.err (!%p829_p7)
}
  0x11   :  { %s884_s22 = smov 128   ;;  %s885_s23 = smov 8  }
  0x12   :  { %22 = dma.hbm_to_vmem [thread:$0]  %s1110_s0, 256, %s17_s13, [#allocation3], %s884_s22, %s884_s22, %s885_s23  }
  0x13   :  { %s886_s26 = smov [#allocation5]   ;;  %s833_s30 = scalar_lea.hbm %s1111_s1, 6144 }
  0x14   :  { %s28_s27 = sshll.u32 %s886_s26, 4  ;;  %p834_p8 = scmp.ne.s32.totalorder %s1111_s1, %s833_s30  ;;  %s29_s27 = int_to_ptr.vmem [resolvable:$true] %s28_s27 }
  0x15   :  { %p837_p9 = scmp.lt.u32.totalorder %s833_s30, %s1111_s1 }
  0x17   :  { %p839_p10 = pnand %p837_p9, %p834_p8 }
  0x19   :  { %842 = shalt.err (!%p839_p10)
}
  0x1a   :  { %s843_s8 = scalar_lea.vmem %s29_s27, 6144  ;;  %p848_p12 = scmp.lt.s32.totalorder %s29_s27, %s29_s27 }
  0x1b   :  { %p844_p11 = scmp.ne.s32.totalorder %s29_s27, %s843_s8  ;;  %p849_p13 = scmp.lt.s32.totalorder %s843_s8, %s843_s8 }
  0x1d   :  { %p850_p0 = por %p849_p13, %p848_p12 }
  0x1f   :  { %p851_p1 = pnand %p850_p0, %p844_p11 }
  0x21   :  { %854 = shalt.err (!%p851_p1)
}
  0x22   :  { %34 = dma.hbm_to_vmem [thread:$0]  %s1111_s1, 6144, %s29_s27, [#allocation6], %s884_s22, %s884_s22, %s885_s23  }
  0x23   :  { %877 = dma.done.wait [#allocation3], 256  }
  0x24   :  { %878 = vsyncadd [#allocation3], 4294967040 }
  0x25   :  { %879 = dma.done.wait [#allocation6], 6144  }
  0x26   :  { %880 = vsyncadd [#allocation6], 4294961152  ;;  %v62_v0 = vld [vmem:[#allocation5 + $0x80] sm:$0xff]  ;;  %v63_v1 = vld [vmem:[#allocation5 + $0x88] sm:$0xff]  ;;  %v94_v28 = vlaneseq }
  0x27   :  { %v46_v2 = vld [vmem:[#allocation5] sm:$0xff]  ;;  %v938_v3 = vpack.c.bf16 %v63_v1, %v62_v0  ;;  %v47_v4 = vld [vmem:[#allocation5 + $0x8] sm:$0xff]  ;;  %v64_v5 = vld [vmem:[#allocation5 + $0x90] sm:$0xff] }
  0x28   :  { %v65_v6 = vld [vmem:[#allocation5 + $0x98] sm:$0xff]  ;;  %v940_v7 = vpack.c.bf16 %v47_v4, %v46_v2  ;;  %v78_v9 = vld [vmem:[#allocation5 + $0x100] sm:$0xff]  ;;  %v79_v10 = vld [vmem:[#allocation5 + $0x108] sm:$0xff]  ;;  %v970_v38 = vshrl.u32 %v94_v28, 7 }
  0x29   :  { %v942_v8 = vpack.c.bf16 %v65_v6, %v64_v5  ;;  %v48_v11 = vld [vmem:[#allocation5 + $0x10] sm:$0xff]  ;;  %679 = vmatprep.subr.bf16.mxu0 %v938_v3  ;;  %v945_v12 = vpack.c.bf16 %v79_v10, %v78_v9  ;;  %v49_v13 = vld [vmem:[#allocation5 + $0x18] sm:$0xff]  ;;  %v66_v14 = vld [vmem:[#allocation5 + $0xa0] sm:$0xff] }
  0x2a   :  { %v67_v15 = vld [vmem:[#allocation5 + $0xa8] sm:$0xff]  ;;  %681 = vmatpush3.bf16.msra.mxu0 %v940_v7  ;;  %v948_v16 = vpack.c.bf16 %v49_v13, %v48_v11  ;;  %v80_v17 = vld [vmem:[#allocation5 + $0x110] sm:$0xff]  ;;  %v81_v18 = vld [vmem:[#allocation5 + $0x118] sm:$0xff]  ;;  %v101_v49 = vand.u32 7, %v970_v38  ;;  %vm134_vm0 = vcmp.lt.s32.totalorder %v970_v38, 7  ;;  %vm127_vm2 = vcmp.lt.s32.totalorder %v970_v38, 1 }
  0x2b   :  { %683 = vmatprep.subr.bf16.mxu0 %v942_v8  ;;  %711 = vmatprep.subr.bf16.mxu1 %v945_v12  ;;  %v952_v19 = vpack.c.bf16 %v67_v15, %v66_v14  ;;  %v954_v20 = vpack.c.bf16 %v81_v18, %v80_v17  ;;  %v50_v21 = vld [vmem:[#allocation5 + $0x20] sm:$0xff]  ;;  %v51_v22 = vld [vmem:[#allocation5 + $0x28] sm:$0xff]  ;;  %v68_v23 = vld [vmem:[#allocation5 + $0xb0] sm:$0xff] }
  0x2c   :  { %713 = vmatpush3.bf16.msra.mxu1 %v945_v12  ;;  %v69_v24 = vld [vmem:[#allocation5 + $0xb8] sm:$0xff]  ;;  %v82_v25 = vld [vmem:[#allocation5 + $0x120] sm:$0xff]  ;;  %v83_v26 = vld [vmem:[#allocation5 + $0x128] sm:$0xff]  ;;  %v961_v29 = vpack.c.bf16 %v51_v22, %v50_v21  ;;  %vm996_vm1 = vcmp.ne.s32.totalorder %v101_v49, 7  ;;  %v96_v22 = vadd.s32 8, %v970_v38  ;;  %vm1024_vm3 = vcmp.ne.s32.totalorder %v101_v49, 0 }
  0x2d   :  { %715 = vmatprep.subr.bf16.mxu1 %v954_v20  ;;  %v958_v27 = vpack.c.bf16 %v83_v26, %v82_v25  ;;  %v84_v30 = vld [vmem:[#allocation5 + $0x130] sm:$0xff]  ;;  %v85_v31 = vld [vmem:[#allocation5 + $0x138] sm:$0xff]  ;;  %v964_v32 = vpack.c.bf16 %v69_v24, %v68_v23  ;;  %v70_v35 = vld [vmem:[#allocation5 + $0xc0] sm:$0xff] }
  0x2e   :  { %685 = vmatpush3.bf16.msra.mxu0 %v948_v16  ;;  %v52_v33 = vld [vmem:[#allocation5 + $0x30] sm:$0xff]  ;;  %v53_v34 = vld [vmem:[#allocation5 + $0x38] sm:$0xff]  ;;  %v71_v36 = vld [vmem:[#allocation5 + $0xc8] sm:$0xff]  ;;  %v968_v37 = vpack.c.bf16 %v85_v31, %v84_v30  ;;  %v108_v28 = vand.u32 7, %v96_v22 }
  0x2f   :  { %687 = vmatprep.subr.bf16.mxu0 %v952_v19  ;;  %v973_v39 = vpack.c.bf16 %v53_v34, %v52_v33  ;;  %v86_v40 = vld [vmem:[#allocation5 + $0x140] sm:$0xff]  ;;  %v87_v41 = vld [vmem:[#allocation5 + $0x148] sm:$0xff]  ;;  %v976_v42 = vpack.c.bf16 %v71_v36, %v70_v35  ;;  %v72_v45 = vld [vmem:[#allocation5 + $0xd0] sm:$0xff] }
  0x30   :  { %717 = vmatpush3.bf16.msra.mxu1 %v954_v20  ;;  %v54_v43 = vld [vmem:[#allocation5 + $0x40] sm:$0xff]  ;;  %v55_v44 = vld [vmem:[#allocation5 + $0x48] sm:$0xff]  ;;  %v73_v46 = vld [vmem:[#allocation5 + $0xd8] sm:$0xff]  ;;  %v980_v47 = vpack.c.bf16 %v87_v41, %v86_v40  ;;  %vm1031_vm4 = vcmp.ne.s32.totalorder %v108_v28, 7  ;;  %vm1041_vm5 = vcmp.ne.s32.totalorder %v108_v28, 0 }
  0x31   :  { %719 = vmatprep.subr.bf16.mxu1 %v958_v27  ;;  %v982_v48 = vld [vmem:[#allocation2] sm:$0xff]  ;;  %v986_v50 = vpack.c.bf16 %v55_v44, %v54_v43  ;;  %v89_v52 = vld [vmem:[#allocation5 + $0x158] sm:$0xff]  ;;  %v994_v55 = vpack.c.bf16 %v73_v46, %v72_v45  ;;  %v74_v60 = vld [vmem:[#allocation5 + $0xe0] sm:$0xff] }
  0x32   :  { %689 = vmatpush3.bf16.msra.mxu0 %v961_v29  ;;  %v88_v51 = vld [vmem:[#allocation5 + $0x150] sm:$0xff]  ;;  %209 = vmatprep.mubr.f32.mxu0 %v982_v48  ;;  %v989_v53 = vld [vmem:[#allocation2 + $0x8] sm:$0xff]  ;;  %v132_v54 = vrot.slane %v982_v48, 1  ;;  %v75_v61 = vld [vmem:[#allocation5 + $0xe8] sm:$0xff]  ;;  %v125_v25 = vrot.slane %v982_v48, 7 }
  0x33   :  { %691 = vmatprep.subr.bf16.mxu0 %v964_v32  ;;  %v56_v56 = vld [vmem:[#allocation5 + $0x50] sm:$0xff]  ;;  %v57_v57 = vld [vmem:[#allocation5 + $0x58] sm:$0xff]  ;;  %v133_v59 = vrot.slane %v989_v53, 1  ;;  %v1003_v62 = vpack.c.bf16 %v89_v52, %v88_v51  ;;  %v90_v1 = vld [vmem:[#allocation5 + $0x160] sm:$0xff]  ;;  %v1013_v4 = vpack.c.bf16 %v75_v61, %v74_v60  ;;  %v126_v26 = vrot.slane %v989_v53, 7 }
  0x34   :  { %721 = vmatpush3.bf16.msra.mxu1 %v958_v27  ;;  %v1008_v0 = vpack.c.bf16 %v57_v57, %v56_v56  ;;  %v91_v2 = vld [vmem:[#allocation5 + $0x168] sm:$0xff]  ;;  %v58_v5 = vld [vmem:[#allocation5 + $0x60] sm:$0xff]  ;;  %v76_v9 = vld [vmem:[#allocation5 + $0xf0] sm:$0xff] }
  0x35   :  { %723 = vmatprep.subr.bf16.mxu1 %v968_v37  ;;  %v135_v63 = vsel %vm134_vm0, %v132_v54, %v133_v59  ;;  %v59_v6 = vld [vmem:[#allocation5 + $0x68] sm:$0xff]  ;;  %v77_v10 = vld [vmem:[#allocation5 + $0xf8] sm:$0xff]  ;;  %v734_v11 = vpack.c.bf16 %v91_v2, %v90_v1  ;;  %v92_v14 = vld [vmem:[#allocation5 + $0x170] sm:$0xff]  ;;  %v129_v31 = vsel %vm127_vm2, %v126_v26, %v125_v25  ;;  %v136_v34 = vsel %vm134_vm0, %v133_v59, %v132_v54 }
  0x36   :  { %693 = vmatpush3.bf16.msra.mxu0 %v973_v39  ;;  %640 = vmatprep.mubr.msk.f32.mxu1 %vm996_vm1, %v135_v63  ;;  %v704_v13 = vpack.c.bf16 %v59_v6, %v58_v5  ;;  %v93_v15 = vld [vmem:[#allocation5 + $0x178] sm:$0xff]  ;;  %v706_v17 = vpack.c.bf16 %v77_v10, %v76_v9  ;;  %v60_v18 = vld [vmem:[#allocation5 + $0x70] sm:$0xff] }
  0x37   :  { %695 = vmatprep.subr.bf16.mxu0 %v976_v42  ;;  %v61_v21 = vld [vmem:[#allocation5 + $0x78] sm:$0xff]  ;;  %v738_v23 = vpack.c.bf16 %v93_v15, %v92_v14 }
  0x38   :  { %725 = vmatpush3.bf16.msra.mxu1 %v968_v37  ;;  %v708_v24 = vpack.c.bf16 %v61_v21, %v60_v18 }
  0x39   :  { %727 = vmatprep.subr.bf16.mxu1 %v980_v47 }
  0x3a   :  { %697 = vmatpush3.bf16.msra.mxu0 %v986_v50 }
  0x3b   :  { %699 = vmatprep.subr.bf16.mxu0 %v994_v55 }
  0x3c   :  { %729 = vmatpush3.bf16.msra.mxu1 %v980_v47 }
  0x3d   :  { %731 = vmatprep.subr.bf16.mxu1 %v1003_v62 }
  0x3e   :  { %701 = vmatpush3.bf16.msra.mxu0 %v1008_v0 }
  0x3f   :  { %703 = vmatprep.subr.bf16.mxu0 %v1013_v4 }
  0x40   :  { %733 = vmatpush3.bf16.msra.mxu1 %v1003_v62 }
  0x41   :  { %735 = vmatprep.subr.bf16.mxu1 %v734_v11 }
  0x42   :  { %705 = vmatpush3.bf16.msra.mxu0 %v704_v13 }
  0x43   :  { %707 = vmatprep.subr.bf16.mxu0 %v706_v17 }
  0x44   :  { %737 = vmatpush3.bf16.msra.mxu1 %v734_v11 }
  0x45   :  { %739 = vmatprep.subr.bf16.mxu1 %v738_v23 }
  0x46   :  { %709 = vmatpush3.bf16.msra.mxu0 %v708_v24 }
  0x47   :  { %743 = vmatprep.subr.bf16.mxu0 %v938_v3  ;;  %v128_v3 = vsel %vm127_vm2, %v125_v25, %v126_v26 }
  0x48   :  { %741 = vmatpush3.bf16.msra.mxu1 %v738_v23 }
  0x49   :  { %488 = vmatmul.mubr.msk.f32.vlgmr.msra.gmra.mrb[0].mxu0 %vm1024_vm3, %v129_v31  ;;  %775 = vmatprep.subr.bf16.mxu1 %v945_v12 }
  0x4a   :  { %214 = vmatprep.mubr.f32.mxu0 %v989_v53  ;;  %745 = vmatpush3.bf16.msra.mxu0 %v940_v7 }
  0x4b   :  { %641 = vmatmul.mubr.msk.f32.vlgmr.msra.gmra.mrb[0].mxu1 %vm1031_vm4, %v136_v34  ;;  %747 = vmatprep.subr.bf16.mxu0 %v942_v8 }
  0x4c   :  { %777 = vmatpush3.bf16.msra.mxu1 %v945_v12  ;;  %v487_v12 = vld [vmem:[%s1112_s2] ss:$0 sm:$0xff]  ;;  %s887_s2 = smov [#allocation7]  }
  0x4d   :  { %489 = vmatmul.mubr.msk.f32.gmra.mrb[2].mxu0 %vm1041_vm5, %v128_v3  ;;  %779 = vmatprep.subr.bf16.mxu1 %v954_v20  ;;  %s474_s11 = sshll.u32 %s887_s2, 4  ;;  %s475_s11 = int_to_ptr.vmem [resolvable:$true] %s474_s11 }
  0x4e   :  { %749 = vmatpush3.bf16.msra.mxu0 %v948_v16  ;;  %s855_s12 = scalar_lea.vmem %s475_s11, 256  ;;  %p860_p3 = scmp.lt.s32.totalorder %s475_s11, %s475_s11 }
  0x4f   :  { %751 = vmatprep.subr.bf16.mxu0 %v952_v19  ;;  %p856_p2 = scmp.ne.s32.totalorder %s475_s11, %s855_s12  ;;  %p861_p4 = scmp.lt.s32.totalorder %s855_s12, %s855_s12 }
  0x50   :  { %781 = vmatpush3.bf16.msra.mxu1 %v954_v20 }
  0x51   :  { %783 = vmatprep.subr.bf16.mxu1 %v958_v27  ;;  %p862_p5 = por %p861_p4, %p860_p3 }
  0x52   :  { %753 = vmatpush3.bf16.msra.mxu0 %v961_v29 }
  0x53   :  { %755 = vmatprep.subr.bf16.mxu0 %v964_v32  ;;  %p863_p6 = pnand %p862_p5, %p856_p2 }
  0x54   :  { %785 = vmatpush3.bf16.msra.mxu1 %v958_v27 }
  0x55   :  { %787 = vmatprep.subr.bf16.mxu1 %v968_v37 }
  0x56   :  { %757 = vmatpush3.bf16.msra.mxu0 %v973_v39 }
  0x57   :  { %759 = vmatprep.subr.bf16.mxu0 %v976_v42 }
  0x58   :  { %789 = vmatpush3.bf16.msra.mxu1 %v968_v37 }
  0x59   :  { %791 = vmatprep.subr.bf16.mxu1 %v980_v47 }
  0x5a   :  { %761 = vmatpush3.bf16.msra.mxu0 %v986_v50 }
  0x5b   :  { %763 = vmatprep.subr.bf16.mxu0 %v994_v55 }
  0x5c   :  { %793 = vmatpush3.bf16.msra.mxu1 %v980_v47 }
  0x5d   :  { %795 = vmatprep.subr.bf16.mxu1 %v1003_v62 }
  0x5e   :  { %765 = vmatpush3.bf16.msra.mxu0 %v1008_v0 }
  0x5f   :  { %767 = vmatprep.subr.bf16.mxu0 %v1013_v4 }
  0x60   :  { %797 = vmatpush3.bf16.msra.mxu1 %v1003_v62 }
  0x61   :  { %799 = vmatprep.subr.bf16.mxu1 %v734_v11 }
  0x62   :  { %769 = vmatpush3.bf16.msra.mxu0 %v704_v13 }
  0x63   :  { %771 = vmatprep.subr.bf16.mxu0 %v706_v17 }
  0x64   :  { %801 = vmatpush3.bf16.msra.mxu1 %v734_v11 }
  0x65   :  { %803 = vmatprep.subr.bf16.mxu1 %v738_v23 }
  0x66   :  { %773 = vmatpush3.bf16.msra.mxu0 %v708_v24 }
  0x68   :  { %805 = vmatpush3.bf16.msra.mxu1 %v738_v23 }
 0x11c   :  { %v528_v7 = vpop.f32.mrb[0].mxu0 }
 0x11d   :  { %v529_v8 = vpop.f32.mrb[1].mxu0 }
 0x11e   :  { %v530_v16 = vadd.f32 %v529_v8, %v528_v7  ;;  %v642_v19 = vpop.f32.mrb[0].mxu1 }
 0x11f   :  { %v286_v20 = vpop.f32.mrb[1].mxu1 }
 0x120   :  { %v531_v27 = vpop.f32.mrb[2].mxu0  ;;  %v212_v29 = vadd.f32 %v530_v16, %v487_v12 }
 0x121   :  { %v532_v32 = vpop.f32.mrb[3].mxu0 }
 0x122   :  { %v533_v36 = vadd.f32 %v532_v32, %v531_v27  ;;  %v287_v37 = vadd.f32 %v286_v20, %v212_v29 }
 0x124   :  { %v217_v39 = vadd.f32 %v533_v36, %v487_v12  ;;  %v295_v40 = vmul.f32 0.01, %v287_v37 }
 0x126   :  { %v292_v41 = vadd.f32 %v642_v19, %v217_v39  ;;  %v297_v42 = vmax.f32 %v287_v37, %v295_v40 }
 0x128   :  { %v296_v43 = vmul.f32 0.01, %v292_v41  ;;  %375 = vmatprep.mubr.f32.mxu0 %v297_v42  ;;  %v299_v46 = vrot.slane %v297_v42, 7  ;;  %v305_v47 = vrot.slane %v297_v42, 1 }
 0x12a   :  { %v298_v44 = vmax.f32 %v292_v41, %v296_v43 }
 0x12c   :  { %v300_v45 = vrot.slane %v298_v44, 7  ;;  %v306_v49 = vrot.slane %v298_v44, 1 }
 0x12e   :  { %v302_v50 = vsel %vm127_vm2, %v300_v45, %v299_v46  ;;  %v307_v51 = vsel %vm134_vm0, %v305_v47, %v306_v49  ;;  %v308_v52 = vsel %vm134_vm0, %v306_v49, %v305_v47  ;;  %v301_v54 = vsel %vm127_vm2, %v299_v46, %v300_v45 }
 0x12f   :  { %492 = vmatmul.mubr.msk.f32.vlgmr.msra.gmra.mrb[4].mxu0 %vm1024_vm3, %v302_v50  ;;  %675 = vmatprep.mubr.msk.f32.mxu1 %vm996_vm1, %v307_v51 }
 0x130   :  { %380 = vmatprep.mubr.f32.mxu0 %v298_v44  ;;  %676 = vmatmul.mubr.msk.f32.vlgmr.msra.gmra.mrb[2].mxu1 %vm1031_vm4, %v308_v52 }
 0x133   :  { %493 = vmatmul.mubr.msk.f32.gmra.mrb[6].mxu0 %vm1041_vm5, %v301_v54 }
 0x202   :  { %v584_v55 = vpop.f32.mrb[4].mxu0 }
 0x203   :  { %v585_v56 = vpop.f32.mrb[5].mxu0  ;;  %v677_v57 = vpop.f32.mrb[2].mxu1 }
 0x204   :  { %v586_v59 = vadd.f32 %v585_v56, %v584_v55  ;;  %v452_v60 = vpop.f32.mrb[3].mxu1 }
 0x206   :  { %v378_v38 = vadd.f32 %v586_v59, %v487_v12  ;;  %v587_v61 = vpop.f32.mrb[6].mxu0 }
 0x207   :  { %v588_v62 = vpop.f32.mrb[7].mxu0 }
 0x208   :  { %v453_v63 = vadd.f32 %v452_v60, %v378_v38  ;;  %v589_v0 = vadd.f32 %v588_v62, %v587_v61 }
 0x20a   :  { %v461_v58 = vadd.f32 %v453_v63, %v982_v48  ;;  %v383_v1 = vadd.f32 %v589_v0, %v487_v12 }
 0x20c   :  { %v463_v2 = vmul.f32 0.01, %v461_v58  ;;  %v458_v4 = vadd.f32 %v677_v57, %v383_v1 }
 0x20e   :  { %v465_v5 = vmax.f32 %v461_v58, %v463_v2  ;;  %v462_v6 = vadd.f32 %v458_v4, %v989_v53 }
 0x210   :  { %467 = vst [vmem:[#allocation7] sm:$0xff] %v465_v5  ;;  %v464_v9 = vmul.f32 0.01, %v462_v6 }
 0x212   :  { %v466_v10 = vmax.f32 %v462_v6, %v464_v9 }
 0x214   :  { %468 = vst [vmem:[#allocation7 + $0x8] sm:$0xff] %v466_v10 }
 0x215   :  { %866 = shalt.err (!%p863_p6)
}
 0x216   :  { %s867_s15 = scalar_lea.hbm %s1113_s3, 256 }
 0x217   :  { %p868_p7 = scmp.ne.s32.totalorder %s1113_s3, %s867_s15  ;;  %p871_p8 = scmp.lt.u32.totalorder %s867_s15, %s1113_s3 }
 0x219   :  { %p873_p9 = pnand %p871_p8, %p868_p7 }
 0x21b   :  { %876 = shalt.err (!%p873_p9)
}
 0x21c   :  { %480 = dma.vmem_to_hbm [thread:$0]  %s475_s11, 256, %s1113_s3, [#allocation4], %s884_s22, %s884_s22, %s885_s23  }
 0x21d   :  { %881 = dma.done.wait [#allocation4], 256  }
 0x21e   :  { %882 = vsyncadd [#allocation4], 4294967040 }
 0x21f   :  { %484 = vsyncpa [#allocation3], 1 }
 0x220   :  { %485 = vsyncpa [#allocation6], 1 }
 0x221   :  { %486 = vsyncpa [#allocation4], 1 }

</bundles_post_ra>
